<compile_context>
chip_gen: v6e
topology: v6e:2x2x1
jax: 0.10.0
libtpu: 0.0.40
codegen_flags: <defaults>
</compile_context>

<pallas_src>
import jax
import jax.numpy as jnp
from jax.experimental import pallas as pl
from jax.experimental.pallas import tpu as pltpu


def _round_up(x, m):
    return (x + m - 1) // m * m


def rnn_classifier_kernel(x_ref, wih_ref, whh_ref, b_ref, wfc_ref, bfc_ref, out_ref):
    """Single-program kernel: hoisted input projection + register-carried recurrence.

    x_ref   : (T, Bp, D)   time-major input; D is NOT lane-padded (Mosaic masks)
    wih_ref : (D, Hp)      input->hidden weight (transposed, zero-padded in H)
    whh_ref : (Hp, Hp)     hidden->hidden weight (transposed, zero-padded)
    b_ref   : (1, Hp)      b_ih + b_hh combined (zero-padded)
    wfc_ref : (Hp, Cp)     fc weight (transposed, zero-padded)
    bfc_ref : (1, Cp)      fc bias (zero-padded)
    out_ref : (Bp, Cp)     padded logits (lane-dense store)
    """
    T, Bp, D = x_ref.shape
    Hp = whh_ref.shape[0]

    # --- Hoisted input projection: one (T*Bp, D) x (D, Hp) MXU matmul for all
    # timesteps, bias folded in. Result stays register-resident (no VMEM scratch
    # round-trip on the serial path).
    x_all = x_ref[...].reshape(T * Bp, D)
    pre = (
        jnp.dot(x_all, wih_ref[...], preferred_element_type=jnp.float32)
        + b_ref[...]
    ).reshape(T, Bp, Hp)

    # Hoist the invariant recurrence weight read out of the loop (16 vregs @ Hp=128).
    # TODO(synk): at H >= ~512 read whh from VMEM inside the step instead (vreg spill).
    whh = whh_ref[...]

    # --- Serial recurrence, statically unrolled (small static T). h0 == 0, so the
    # first step is just tanh(pre[0]) with no matmul.
    h = jnp.tanh(pre[0])
    for t in range(1, T):
        h = jnp.tanh(pre[t] + jnp.dot(h, whh, preferred_element_type=jnp.float32))

    # --- FC head on the last hidden state; lane-dense (Bp, Cp) store.
    out_ref[...] = (
        jnp.dot(h, wfc_ref[...], preferred_element_type=jnp.float32) + bfc_ref[...]
    )


def rnn_classifier_forward(x, params):
    """x: (B, 1, T, D) float32, matching the torch module's squeeze(1)."""
    w_ih, w_hh, b_ih, b_hh, w_fc, b_fc = (
        params["w_ih"], params["w_hh"], params["b_ih"],
        params["b_hh"], params["w_fc"], params["b_fc"],
    )
    B, _, T, D = x.shape
    H = w_hh.shape[0]
    C = w_fc.shape[0]

    Bp = _round_up(B, 8)      # sublane-aligned batch (no-op when B % 8 == 0)
    Hp = _round_up(H, 128)    # lane-aligned hidden
    Cp = _round_up(C, 128)    # lane-aligned logits (lane-dense output store)

    # Single fused copy of x: squeeze channel, go time-major, pad batch sublanes.
    # D stays un-padded (32 lanes) -> no 4x lane-padding waste on the input DMA.
    xs = jnp.transpose(x[:, 0, :, :], (1, 0, 2)).astype(jnp.float32)   # (T, B, D)
    if Bp != B:
        xs = jnp.pad(xs, ((0, 0), (0, Bp - B), (0, 0)))                # (T, Bp, D)

    # Tiny one-time weight prep: transpose + zero-pad H/C to 128 lanes, fuse biases.
    wih_t = jnp.zeros((D, Hp), jnp.float32).at[:, :H].set(w_ih.T.astype(jnp.float32))
    whh_t = jnp.zeros((Hp, Hp), jnp.float32).at[:H, :H].set(w_hh.T.astype(jnp.float32))
    b = jnp.zeros((1, Hp), jnp.float32).at[0, :H].set((b_ih + b_hh).astype(jnp.float32))
    wfc_t = jnp.zeros((Hp, Cp), jnp.float32).at[:H, :C].set(w_fc.T.astype(jnp.float32))
    bfc = jnp.zeros((1, Cp), jnp.float32).at[0, :C].set(b_fc.astype(jnp.float32))

    # VMEM budget, clamped below v7x's 64 MiB physical VMEM.
    vmem_bytes = 4 * (
        T * Bp * D                                   # x
        + D * Hp + Hp * Hp + Hp + Hp * Cp + Cp       # weights / biases
        + Bp * Cp                                    # output
    )
    vmem_limit = min(max(4 * 1024 * 1024, 2 * vmem_bytes), 48 * 1024 * 1024)

    out_pad = pl.pallas_call(
        rnn_classifier_kernel,
        out_shape=jax.ShapeDtypeStruct((Bp, Cp), jnp.float32),
        in_specs=[
            pl.BlockSpec(memory_space=pltpu.MemorySpace.VMEM),  # x (T,Bp,D)
            pl.BlockSpec(memory_space=pltpu.MemorySpace.VMEM),  # W_ih^T
            pl.BlockSpec(memory_space=pltpu.MemorySpace.VMEM),  # W_hh^T
            pl.BlockSpec(memory_space=pltpu.MemorySpace.VMEM),  # b_ih + b_hh
            pl.BlockSpec(memory_space=pltpu.MemorySpace.VMEM),  # W_fc^T
            pl.BlockSpec(memory_space=pltpu.MemorySpace.VMEM),  # b_fc
        ],
        out_specs=pl.BlockSpec(memory_space=pltpu.MemorySpace.VMEM),
        compiler_params=pltpu.CompilerParams(vmem_limit_bytes=vmem_limit),
    )(xs, wih_t, whh_t, b, wfc_t, bfc)

    return out_pad[:B, :C]


def reference_forward(x, params):
    """Pure-JAX reference matching torch nn.RNN(tanh) + Linear semantics."""
    w_ih, w_hh, b_ih, b_hh, w_fc, b_fc = (
        params["w_ih"], params["w_hh"], params["b_ih"],
        params["b_hh"], params["w_fc"], params["b_fc"],
    )
    xs = x[:, 0, :, :]                       # (B, T, D)
    B, T, D = xs.shape
    H = w_hh.shape[0]
    h = jnp.zeros((B, H), jnp.float32)
    for t in range(T):
        h = jnp.tanh(xs[:, t, :] @ w_ih.T + b_ih + h @ w_hh.T + b_hh)
    return h @ w_fc.T + b_fc


def init_params(key, input_size, hidden_size, num_classes):
    """Deterministic init mimicking PyTorch's U(-1/sqrt(H), 1/sqrt(H))."""
    ks = jax.random.split(key, 6)
    s = 1.0 / jnp.sqrt(hidden_size)
    u = lambda k, shape: jax.random.uniform(k, shape, jnp.float32, -s, s)
    return {
        "w_ih": u(ks[0], (hidden_size, input_size)),
        "w_hh": u(ks[1], (hidden_size, hidden_size)),
        "b_ih": u(ks[2], (hidden_size,)),
        "b_hh": u(ks[3], (hidden_size,)),
        "w_fc": u(ks[4], (num_classes, hidden_size)),
        "b_fc": u(ks[5], (num_classes,)),
    }


if __name__ == "__main__":
    hidden_size = 64
    input_size = 32
    num_classes = 10
    batch = 2
    seq = 8

    key = jax.random.PRNGKey(0)
    kx, kp = jax.random.split(key)
    x = jax.random.normal(kx, (batch, 1, seq, input_size), jnp.float32)
    params = init_params(kp, input_size, hidden_size, num_classes)

    out = rnn_classifier_forward(x, params)
    out = jax.block_until_ready(out)

    ref = reference_forward(x, params)
    assert out.shape == (batch, num_classes)
    assert jnp.allclose(out, ref, atol=1e-4, rtol=1e-4)
    print("KERNEL_OK")
</pallas_src>

<mosaic_0001>
module attributes {stable_mosaic.version = 11 : i64} {
  func.func @rnn_classifier_kernel(%arg0: memref<8x8x32xf32, #tpu.memory_space<vmem>>, %arg1: memref<32x128xf32, #tpu.memory_space<vmem>>, %arg2: memref<128x128xf32, #tpu.memory_space<vmem>>, %arg3: memref<1x128xf32, #tpu.memory_space<vmem>>, %arg4: memref<128x128xf32, #tpu.memory_space<vmem>>, %arg5: memref<1x128xf32, #tpu.memory_space<vmem>>, %arg6: memref<8x128xf32, #tpu.memory_space<vmem>>) attributes {dimension_semantics = [], scalar_prefetch = 0 : i64, scratch_operands = 0 : i64, tpu.core_type = #tpu.core_type<tc>} {
    %c0 = arith.constant 0 : index
    %c0_0 = arith.constant 0 : index
    %c0_1 = arith.constant 0 : index
    %0 = vector.load %arg0[%c0, %c0_0, %c0_1] : memref<8x8x32xf32, #tpu.memory_space<vmem>>, vector<8x8x32xf32>
    %1 = vector.shape_cast %0 : vector<8x8x32xf32> to vector<64x32xf32>
    %c0_2 = arith.constant 0 : index
    %c0_3 = arith.constant 0 : index
    %2 = vector.load %arg1[%c0_2, %c0_3] : memref<32x128xf32, #tpu.memory_space<vmem>>, vector<32x128xf32>
    %cst = arith.constant dense<0.000000e+00> : vector<64x128xf32>
    %3 = tpu.matmul %1, %2, %cst {dimension_numbers = #tpu.dot_dimension_numbers<[1], [0], [0], [1], [0, 0, 1, 1], [], []>} : vector<64x32xf32>, vector<32x128xf32>, vector<64x128xf32> -> vector<64x128xf32>
    %c0_4 = arith.constant 0 : index
    %c0_5 = arith.constant 0 : index
    %4 = vector.load %arg3[%c0_4, %c0_5] : memref<1x128xf32, #tpu.memory_space<vmem>>, vector<1x128xf32>
    %5 = vector.broadcast %4 : vector<1x128xf32> to vector<64x128xf32>
    %6 = arith.addf %3, %5 : vector<64x128xf32>
    %7 = vector.shape_cast %6 : vector<64x128xf32> to vector<8x8x128xf32>
    %c0_6 = arith.constant 0 : index
    %c0_7 = arith.constant 0 : index
    %8 = vector.load %arg2[%c0_6, %c0_7] : memref<128x128xf32, #tpu.memory_space<vmem>>, vector<128x128xf32>
    %9 = vector.extract_strided_slice %7 {offsets = [0, 0, 0], sizes = [1, 8, 128], strides = [1, 1, 1]} : vector<8x8x128xf32> to vector<1x8x128xf32>
    %10 = vector.shape_cast %9 : vector<1x8x128xf32> to vector<8x128xf32>
    %11 = math.tanh %10 : vector<8x128xf32>
    %12 = vector.extract_strided_slice %7 {offsets = [1, 0, 0], sizes = [1, 8, 128], strides = [1, 1, 1]} : vector<8x8x128xf32> to vector<1x8x128xf32>
    %13 = vector.shape_cast %12 : vector<1x8x128xf32> to vector<8x128xf32>
    %cst_8 = arith.constant dense<0.000000e+00> : vector<8x128xf32>
    %14 = tpu.matmul %11, %8, %cst_8 {dimension_numbers = #tpu.dot_dimension_numbers<[1], [0], [0], [1], [0, 0, 1, 1], [], []>} : vector<8x128xf32>, vector<128x128xf32>, vector<8x128xf32> -> vector<8x128xf32>
    %15 = arith.addf %13, %14 : vector<8x128xf32>
    %16 = math.tanh %15 : vector<8x128xf32>
    %17 = vector.extract_strided_slice %7 {offsets = [2, 0, 0], sizes = [1, 8, 128], strides = [1, 1, 1]} : vector<8x8x128xf32> to vector<1x8x128xf32>
    %18 = vector.shape_cast %17 : vector<1x8x128xf32> to vector<8x128xf32>
    %cst_9 = arith.constant dense<0.000000e+00> : vector<8x128xf32>
    %19 = tpu.matmul %16, %8, %cst_9 {dimension_numbers = #tpu.dot_dimension_numbers<[1], [0], [0], [1], [0, 0, 1, 1], [], []>} : vector<8x128xf32>, vector<128x128xf32>, vector<8x128xf32> -> vector<8x128xf32>
    %20 = arith.addf %18, %19 : vector<8x128xf32>
    %21 = math.tanh %20 : vector<8x128xf32>
    %22 = vector.extract_strided_slice %7 {offsets = [3, 0, 0], sizes = [1, 8, 128], strides = [1, 1, 1]} : vector<8x8x128xf32> to vector<1x8x128xf32>
    %23 = vector.shape_cast %22 : vector<1x8x128xf32> to vector<8x128xf32>
    %cst_10 = arith.constant dense<0.000000e+00> : vector<8x128xf32>
    %24 = tpu.matmul %21, %8, %cst_10 {dimension_numbers = #tpu.dot_dimension_numbers<[1], [0], [0], [1], [0, 0, 1, 1], [], []>} : vector<8x128xf32>, vector<128x128xf32>, vector<8x128xf32> -> vector<8x128xf32>
    %25 = arith.addf %23, %24 : vector<8x128xf32>
    %26 = math.tanh %25 : vector<8x128xf32>
    %27 = vector.extract_strided_slice %7 {offsets = [4, 0, 0], sizes = [1, 8, 128], strides = [1, 1, 1]} : vector<8x8x128xf32> to vector<1x8x128xf32>
    %28 = vector.shape_cast %27 : vector<1x8x128xf32> to vector<8x128xf32>
    %cst_11 = arith.constant dense<0.000000e+00> : vector<8x128xf32>
    %29 = tpu.matmul %26, %8, %cst_11 {dimension_numbers = #tpu.dot_dimension_numbers<[1], [0], [0], [1], [0, 0, 1, 1], [], []>} : vector<8x128xf32>, vector<128x128xf32>, vector<8x128xf32> -> vector<8x128xf32>
    %30 = arith.addf %28, %29 : vector<8x128xf32>
    %31 = math.tanh %30 : vector<8x128xf32>
    %32 = vector.extract_strided_slice %7 {offsets = [5, 0, 0], sizes = [1, 8, 128], strides = [1, 1, 1]} : vector<8x8x128xf32> to vector<1x8x128xf32>
    %33 = vector.shape_cast %32 : vector<1x8x128xf32> to vector<8x128xf32>
    %cst_12 = arith.constant dense<0.000000e+00> : vector<8x128xf32>
    %34 = tpu.matmul %31, %8, %cst_12 {dimension_numbers = #tpu.dot_dimension_numbers<[1], [0], [0], [1], [0, 0, 1, 1], [], []>} : vector<8x128xf32>, vector<128x128xf32>, vector<8x128xf32> -> vector<8x128xf32>
    %35 = arith.addf %33, %34 : vector<8x128xf32>
    %36 = math.tanh %35 : vector<8x128xf32>
    %37 = vector.extract_strided_slice %7 {offsets = [6, 0, 0], sizes = [1, 8, 128], strides = [1, 1, 1]} : vector<8x8x128xf32> to vector<1x8x128xf32>
    %38 = vector.shape_cast %37 : vector<1x8x128xf32> to vector<8x128xf32>
    %cst_13 = arith.constant dense<0.000000e+00> : vector<8x128xf32>
    %39 = tpu.matmul %36, %8, %cst_13 {dimension_numbers = #tpu.dot_dimension_numbers<[1], [0], [0], [1], [0, 0, 1, 1], [], []>} : vector<8x128xf32>, vector<128x128xf32>, vector<8x128xf32> -> vector<8x128xf32>
    %40 = arith.addf %38, %39 : vector<8x128xf32>
    %41 = math.tanh %40 : vector<8x128xf32>
    %42 = vector.extract_strided_slice %7 {offsets = [7, 0, 0], sizes = [1, 8, 128], strides = [1, 1, 1]} : vector<8x8x128xf32> to vector<1x8x128xf32>
    %43 = vector.shape_cast %42 : vector<1x8x128xf32> to vector<8x128xf32>
    %cst_14 = arith.constant dense<0.000000e+00> : vector<8x128xf32>
    %44 = tpu.matmul %41, %8, %cst_14 {dimension_numbers = #tpu.dot_dimension_numbers<[1], [0], [0], [1], [0, 0, 1, 1], [], []>} : vector<8x128xf32>, vector<128x128xf32>, vector<8x128xf32> -> vector<8x128xf32>
    %45 = arith.addf %43, %44 : vector<8x128xf32>
    %46 = math.tanh %45 : vector<8x128xf32>
    %c0_15 = arith.constant 0 : index
    %c0_16 = arith.constant 0 : index
    %47 = vector.load %arg4[%c0_15, %c0_16] : memref<128x128xf32, #tpu.memory_space<vmem>>, vector<128x128xf32>
    %cst_17 = arith.constant dense<0.000000e+00> : vector<8x128xf32>
    %48 = tpu.matmul %46, %47, %cst_17 {dimension_numbers = #tpu.dot_dimension_numbers<[1], [0], [0], [1], [0, 0, 1, 1], [], []>} : vector<8x128xf32>, vector<128x128xf32>, vector<8x128xf32> -> vector<8x128xf32>
    %c0_18 = arith.constant 0 : index
    %c0_19 = arith.constant 0 : index
    %49 = vector.load %arg5[%c0_18, %c0_19] : memref<1x128xf32, #tpu.memory_space<vmem>>, vector<1x128xf32>
    %50 = vector.broadcast %49 : vector<1x128xf32> to vector<8x128xf32>
    %51 = arith.addf %48, %50 : vector<8x128xf32>
    %c0_20 = arith.constant 0 : index
    %c0_21 = arith.constant 0 : index
    %52 = vector.load %arg6[%c0_20, %c0_21] : memref<8x128xf32, #tpu.memory_space<vmem>>, vector<8x128xf32>
    tpu.vector_store %arg6[%c0_20, %c0_21], %51 {strides = array<i32>} : memref<8x128xf32, #tpu.memory_space<vmem>>, vector<8x128xf32>,
    return
  }
}

</mosaic_0001>

<bundles_post_ra>
// kernel: tpu_custom_call.1
= control target key start
LH: loop header
LB: loop body
LE: loop exit
PB: predicated region body
PF: predicated region fallthrough
CT: control target
= control target key end

     0   :  { %11 = vsyncpa [#allocation3], 0  ;;  %s1846_s0 = inlined_call_operand.hbm [shape: f32[8,8,32], index: 0, kind: input, shape index: {}]   ;;  %s1847_s1 = inlined_call_operand.hbm [shape: f32[32,128], index: 1, kind: input, shape index: {}]   ;;  %s1848_s2 = inlined_call_operand.hbm [shape: f32[128,128], index: 2, kind: input, shape index: {}]   ;;  %s1849_s3 = inlined_call_operand.vmem [shape: f32[1,128], index: 3, kind: input, shape index: {}]   ;;  %s1850_s4 = inlined_call_operand.hbm [shape: f32[128,128], index: 4, kind: input, shape index: {}]   ;;  %s1851_s5 = inlined_call_operand.vmem [shape: f32[1,128], index: 5, kind: input, shape index: {}]   ;;  %s1852_s6 = inlined_call_operand.hbm [shape: f32[8,128], index: 6, kind: output, shape index: {}]  }
   0x1   :  { %12 = vsyncpa [#allocation6], 0 }
   0x2   :  { %13 = vsyncpa [#allocation9], 0 }
   0x3   :  { %14 = vsyncpa [#allocation4], 0  ;;  %s1451_s21 = smov [#allocation5]   ;;  %s1452_s23 = smov [#allocation2]  }
   0x4   :  { %s32_s22 = sshll.u32 %s1451_s21, 4  ;;  %s20_s24 = sshll.u32 %s1452_s23, 4  ;;  %s33_s22 = int_to_ptr.vmem [resolvable:$true] %s32_s22  ;;  %s21_s24 = int_to_ptr.vmem [resolvable:$true] %s20_s24 }
   0x5   :  { %s1351_s25 = scalar_lea.vmem %s33_s22, 512  ;;  %p1356_p1 = scmp.lt.s32.totalorder %s33_s22, %s33_s22 }
   0x6   :  { %p1352_p0 = scmp.ne.s32.totalorder %s33_s22, %s1351_s25  ;;  %p1357_p2 = scmp.lt.s32.totalorder %s1351_s25, %s1351_s25 }
   0x8   :  { %p1358_p3 = por %p1357_p2, %p1356_p1 }
   0xa   :  { %p1359_p4 = pnand %p1358_p3, %p1352_p0 }
   0xc   :  { %1362 = shalt.err (!%p1359_p4)
}
   0xd   :  { %s1453_s26 = smov 128   ;;  %s1454_s27 = smov 8  }
   0xe   :  { %38 = dma.hbm_to_vmem [thread:$0]  %s1847_s1, 512, %s33_s22, [#allocation6], %s1453_s26, %s1453_s26, %s1454_s27  }
   0xf   :  { %s1371_s30 = scalar_lea.vmem %s21_s24, 1024  ;;  %p1376_p6 = scmp.lt.s32.totalorder %s21_s24, %s21_s24 }
  0x10   :  { %p1372_p5 = scmp.ne.s32.totalorder %s21_s24, %s1371_s30  ;;  %p1377_p7 = scmp.lt.s32.totalorder %s1371_s30, %s1371_s30 }
  0x12   :  { %p1378_p8 = por %p1377_p7, %p1376_p6 }
  0x14   :  { %p1379_p9 = pnand %p1378_p8, %p1372_p5 }
  0x16   :  { %1382 = shalt.err (!%p1379_p9)
}
  0x17   :  { %26 = dma.hbm_to_vmem [thread:$0]  %s1846_s0, 1024, %s21_s24, [#allocation3], %s1453_s26, %s1453_s26, %s1454_s27  }
  0x18   :  { %s1455_s9 = smov [#allocation7]   ;;  %s1456_s11 = smov [#allocation8]  }
  0x19   :  { %s44_s10 = sshll.u32 %s1455_s9, 4  ;;  %s58_s12 = sshll.u32 %s1456_s11, 4  ;;  %s45_s10 = int_to_ptr.vmem [resolvable:$true] %s44_s10  ;;  %s59_s12 = int_to_ptr.vmem [resolvable:$true] %s58_s12 }
  0x1a   :  { %s1391_s1 = scalar_lea.vmem %s45_s10, 2048  ;;  %p1396_p11 = scmp.lt.s32.totalorder %s45_s10, %s45_s10 }
  0x1b   :  { %p1392_p10 = scmp.ne.s32.totalorder %s45_s10, %s1391_s1  ;;  %p1397_p12 = scmp.lt.s32.totalorder %s1391_s1, %s1391_s1 }
  0x1d   :  { %p1398_p13 = por %p1397_p12, %p1396_p11 }
  0x1f   :  { %p1399_p0 = pnand %p1398_p13, %p1392_p10 }
  0x21   :  { %1402 = shalt.err (!%p1399_p0)
}
  0x22   :  { %50 = dma.hbm_to_vmem [thread:$0]  %s1848_s2, 2048, %s45_s10, [#allocation6], %s1453_s26, %s1453_s26, %s1454_s27  }
  0x23   :  { %s1411_s0 = scalar_lea.vmem %s59_s12, 2048  ;;  %p1416_p2 = scmp.lt.s32.totalorder %s59_s12, %s59_s12 }
  0x24   :  { %p1412_p1 = scmp.ne.s32.totalorder %s59_s12, %s1411_s0  ;;  %p1417_p3 = scmp.lt.s32.totalorder %s1411_s0, %s1411_s0 }
  0x26   :  { %p1418_p4 = por %p1417_p3, %p1416_p2 }
  0x28   :  { %p1419_p5 = pnand %p1418_p4, %p1412_p1 }
  0x2a   :  { %1422 = shalt.err (!%p1419_p5)
}
  0x2b   :  { %64 = dma.hbm_to_vmem [thread:$0]  %s1850_s4, 2048, %s59_s12, [#allocation9], %s1453_s26, %s1453_s26, %s1454_s27  }
  0x2c   :  { %1443 = dma.done.wait [#allocation3], 1024  }
  0x2d   :  { %1444 = vsyncadd [#allocation3], 4294966272 }
  0x2e   :  { %1445 = dma.done.wait [#allocation6], 2560  }
  0x2f   :  { %1446 = vsyncadd [#allocation6], 4294964736 }
  0x30   :  { %1447 = dma.done.wait [#allocation9], 2048  }
  0x31   :  { %1448 = vsyncadd [#allocation9], 4294965248  ;;  %v1457_v0 = vmov 0.0   ;;  %vm98_vm0 = vcmask 261120   ;;  %v90_v1 = vld [vmem:[#allocation5 + $0x18] sm:$0xff]  ;;  %v89_v2 = vld [vmem:[#allocation5 + $0x10] sm:$0xff] }
  0x32   :  { %1038 = vmatprep.subr.mxu1 %v1457_v0  ;;  %1018 = vmatprep.subr.mxu0 %v90_v1  ;;  %v79_v3 = vld [vmem:[#allocation2] sm:$0xff]  ;;  %v88_v4 = vld [vmem:[#allocation5 + $0x8] sm:$0xff]  ;;  %v1521_v5 = vld [vmem:[#allocation7 + $0x78] sm:$0xff]  ;;  %vm1458_vm1 = vmmov 0   ;;  %s1459_s18 = smov [#allocation10]  }
  0x33   :  { %1019 = vmatpush3.msra.mxu0 %v90_v1  ;;  %1026 = vmatprep.mubr.msk.f32.mxu0 %vm98_vm0, %v79_v3  ;;  %v1523_v6 = vld [vmem:[#allocation7 + $0x70] sm:$0xff]  ;;  %v87_v7 = vld [vmem:[#allocation5] sm:$0xff]  ;;  %v1527_v8 = vld [vmem:[#allocation7 + $0x68] sm:$0xff]  ;;  %s849_s19 = sshll.u32 %s1459_s18, 4  ;;  %s850_s19 = int_to_ptr.vmem [resolvable:$true] %s849_s19 }
  0x34   :  { %1020 = vmatprep.subr.mxu0 %v89_v2  ;;  %1039 = vmatpush3.msra.mxu1 %v1521_v5  ;;  %v80_v9 = vld [vmem:[#allocation2 + $0x8] sm:$0xff]  ;;  %v1531_v10 = vld [vmem:[#allocation7 + $0x60] sm:$0xff]  ;;  %v1535_v11 = vld [vmem:[#allocation7 + $0x58] sm:$0xff]  ;;  %s1423_s20 = scalar_lea.vmem %s850_s19, 128  ;;  %p1428_p7 = scmp.lt.s32.totalorder %s850_s19, %s850_s19 }
  0x35   :  { %1021 = vmatpush3.msra.mxu0 %v89_v2  ;;  %1040 = vmatprep.subr.mxu1 %v1457_v0  ;;  %v1540_v12 = vld [vmem:[#allocation7 + $0x50] sm:$0xff]  ;;  %v1559_v13 = vld [vmem:[#allocation7 + $0x48] sm:$0xff]  ;;  %v1564_v14 = vld [vmem:[#allocation7 + $0x40] sm:$0xff]  ;;  %p1424_p6 = scmp.ne.s32.totalorder %s850_s19, %s1423_s20  ;;  %p1429_p8 = scmp.lt.s32.totalorder %s1423_s20, %s1423_s20 }
  0x36   :  { %1022 = vmatprep.subr.mxu0 %v88_v4  ;;  %1041 = vmatpush3.msra.mxu1 %v1523_v6  ;;  %v1570_v15 = vld [vmem:[#allocation7 + $0x38] sm:$0xff]  ;;  %v1576_v16 = vld [vmem:[#allocation7 + $0x30] sm:$0xff]  ;;  %v1578_v17 = vld [vmem:[#allocation7 + $0x28] sm:$0xff] }
  0x37   :  { %1023 = vmatpush3.msra.mxu0 %v88_v4  ;;  %1042 = vmatprep.subr.mxu1 %v1457_v0  ;;  %v1585_v18 = vld [vmem:[#allocation7 + $0x20] sm:$0xff]  ;;  %v1591_v19 = vld [vmem:[#allocation7 + $0x18] sm:$0xff]  ;;  %v1597_v20 = vld [vmem:[#allocation7 + $0x10] sm:$0xff]  ;;  %p1430_p9 = por %p1429_p8, %p1428_p7 }
  0x38   :  { %1024 = vmatprep.subr.mxu0 %v87_v7  ;;  %1043 = vmatpush3.msra.mxu1 %v1527_v8  ;;  %v1603_v21 = vld [vmem:[#allocation7 + $0x8] sm:$0xff]  ;;  %v1609_v22 = vld [vmem:[#allocation7] sm:$0xff]  ;;  %v81_v28 = vld [vmem:[#allocation2 + $0x10] sm:$0xff] }
  0x39   :  { %1025 = vmatpush3.msra.mxu0 %v87_v7  ;;  %1044 = vmatprep.subr.mxu1 %v1457_v0  ;;  %v1624_v24 = vld [vmem:[%s1849_s3] ss:$0 sm:$0xff]  ;;  %v82_v29 = vld [vmem:[#allocation2 + $0x18] sm:$0xff]  ;;  %v84_v31 = vld [vmem:[#allocation2 + $0x28] sm:$0xff]  ;;  %p1431_p10 = pnand %p1430_p9, %p1424_p6 }
  0x3a   :  { %1027 = vmatmul.mubr.msk.f32.vlgmr.msra.gmra.mxu0 %vm98_vm0, %v80_v9  ;;  %1045 = vmatpush3.msra.mxu1 %v1531_v10  ;;  %v83_v30 = vld [vmem:[#allocation2 + $0x20] sm:$0xff]  ;;  %v85_v32 = vld [vmem:[#allocation2 + $0x30] sm:$0xff]  ;;  %v86_v33 = vld [vmem:[#allocation2 + $0x38] sm:$0xff] }
  0x3b   :  { %1046 = vmatprep.subr.mxu1 %v1457_v0  ;;  %1073 = vmatprep.subr.mxu0 %v1457_v0  ;;  %v764_v2 = vld [vmem:[#allocation8 + $0x78] sm:$0xff]  ;;  %v763_v3 = vld [vmem:[#allocation8 + $0x70] sm:$0xff]  ;;  %v762_v4 = vld [vmem:[#allocation8 + $0x68] sm:$0xff] }
  0x3c   :  { %1047 = vmatpush3.msra.mxu1 %v1535_v11  ;;  %1074 = vmatpush3.msra.mxu0 %v1521_v5  ;;  %v759_v7 = vld [vmem:[#allocation8 + $0x50] sm:$0xff] }
  0x3d   :  { %1048 = vmatprep.subr.mxu1 %v1457_v0  ;;  %1075 = vmatprep.subr.mxu0 %v1457_v0 }
  0x3e   :  { %1049 = vmatpush3.msra.mxu1 %v1540_v12  ;;  %1076 = vmatpush3.msra.mxu0 %v1523_v6 }
  0x3f   :  { %1050 = vmatprep.subr.mxu1 %v1457_v0  ;;  %1077 = vmatprep.subr.mxu0 %v1457_v0 }
  0x40   :  { %1078 = vmatpush3.msra.mxu0 %v1527_v8  ;;  %1051 = vmatpush3.msra.mxu1 %v1559_v13 }
  0x41   :  { %1079 = vmatprep.subr.mxu0 %v1457_v0  ;;  %1052 = vmatprep.subr.mxu1 %v1457_v0 }
  0x42   :  { %1080 = vmatpush3.msra.mxu0 %v1531_v10  ;;  %1053 = vmatpush3.msra.mxu1 %v1564_v14 }
  0x43   :  { %1081 = vmatprep.subr.mxu0 %v1457_v0  ;;  %1054 = vmatprep.subr.mxu1 %v1457_v0 }
  0x44   :  { %1082 = vmatpush3.msra.mxu0 %v1535_v11  ;;  %1055 = vmatpush3.msra.mxu1 %v1570_v15 }
  0x45   :  { %1083 = vmatprep.subr.mxu0 %v1457_v0  ;;  %1056 = vmatprep.subr.mxu1 %v1457_v0 }
  0x46   :  { %1084 = vmatpush3.msra.mxu0 %v1540_v12  ;;  %1057 = vmatpush3.msra.mxu1 %v1576_v16 }
  0x47   :  { %1085 = vmatprep.subr.mxu0 %v1457_v0  ;;  %1070 = vmatprep.mubr.msk.f32.mxu1 %vm1458_vm1, %v1457_v0 }
  0x48   :  { %1086 = vmatpush3.msra.mxu0 %v1559_v13  ;;  %1058 = vmatprep.subr.mxu1 %v1457_v0 }
  0x49   :  { %1087 = vmatprep.subr.mxu0 %v1457_v0  ;;  %1059 = vmatpush3.msra.mxu1 %v1578_v17 }
  0x4a   :  { %1088 = vmatpush3.msra.mxu0 %v1564_v14  ;;  %1060 = vmatprep.subr.mxu1 %v1457_v0 }
  0x4b   :  { %1089 = vmatprep.subr.mxu0 %v1457_v0  ;;  %1061 = vmatpush3.msra.mxu1 %v1585_v18 }
  0x4c   :  { %1090 = vmatpush3.msra.mxu0 %v1570_v15  ;;  %1062 = vmatprep.subr.mxu1 %v1457_v0 }
  0x4d   :  { %1091 = vmatprep.subr.mxu0 %v1457_v0  ;;  %1063 = vmatpush3.msra.mxu1 %v1591_v19 }
  0x4e   :  { %1092 = vmatpush3.msra.mxu0 %v1576_v16  ;;  %1064 = vmatprep.subr.mxu1 %v1457_v0 }
  0x4f   :  { %1093 = vmatprep.subr.mxu0 %v1457_v0  ;;  %1065 = vmatpush3.msra.mxu1 %v1597_v20 }
  0x50   :  { %1094 = vmatpush3.msra.mxu0 %v1578_v17  ;;  %1066 = vmatprep.subr.mxu1 %v1457_v0 }
  0x51   :  { %1095 = vmatprep.subr.mxu0 %v1457_v0  ;;  %1067 = vmatpush3.msra.mxu1 %v1603_v21 }
  0x52   :  { %1096 = vmatpush3.msra.mxu0 %v1585_v18  ;;  %1068 = vmatprep.subr.mxu1 %v1457_v0 }
  0x53   :  { %1097 = vmatprep.subr.mxu0 %v1457_v0  ;;  %1069 = vmatpush3.msra.mxu1 %v1609_v22 }
  0x54   :  { %1098 = vmatpush3.msra.mxu0 %v1591_v19  ;;  %1108 = vmatprep.subr.mxu1 %v1457_v0 }
  0x55   :  { %1099 = vmatprep.subr.mxu0 %v1457_v0  ;;  %1029 = vmatprep.mubr.msk.f32.mxu0 %vm98_vm0, %v81_v28 }
  0x56   :  { %1100 = vmatpush3.msra.mxu0 %v1597_v20 }
  0x57   :  { %1101 = vmatprep.subr.mxu0 %v1457_v0  ;;  %1030 = vmatmul.mubr.msk.f32.gmra.mxu0 %vm98_vm0, %v82_v29  ;;  %v869_v29 = vld [vmem:[%s1851_s5] ss:$0 sm:$0xff] }
  0x58   :  { %1102 = vmatpush3.msra.mxu0 %v1603_v21  ;;  %1032 = vmatprep.mubr.msk.f32.mxu0 %vm98_vm0, %v83_v30 }
  0x59   :  { %1103 = vmatprep.subr.mxu0 %v1457_v0 }
  0x5a   :  { %1104 = vmatpush3.msra.mxu0 %v1609_v22 }
  0x5b   :  { %1143 = vmatprep.subr.mxu0 %v1457_v0  ;;  %1033 = vmatmul.mubr.msk.f32.gmra.mxu0 %vm98_vm0, %v84_v31 }
  0x5c   :  { %1035 = vmatprep.mubr.msk.f32.mxu0 %vm98_vm0, %v85_v32 }
  0x5f   :  { %1036 = vmatmul.mubr.msk.f32.gmra.mxu0 %vm98_vm0, %v86_v33 }
  0x60   :  { %1105 = vmatprep.mubr.msk.f32.mxu0 %vm1458_vm1, %v1457_v0 }
  0xfa   :  { %v1028_v23 = vpop.f32.mrf.mxu0 }
  0xfb   :  { %v195_v34 = vadd.f32 %v1028_v23, %v1624_v24 }
  0xfc   :  { %v189_v25 = vpop.f32.mrf.mxu0 }
  0xfd   :  { %v190_v26 = vadd.f32 %v1624_v24, %v189_v25 }
  0xff   :  { %1327 = vtanh.f32 %v190_v26 }
 0x10c   :  { %v1328_v27 = vpop.eup %1327 }
 0x10d   :  { %1071 = vmatmul.mubr.f32.vlgmr.msra.gmra.mxu1 %v1328_v27 }
 0x10e   :  { %1109 = vmatpush3.msra.mxu1 %v1521_v5  ;;  %1140 = vmatprep.mubr.msk.f32.mxu1 %vm1458_vm1, %v1457_v0 }
 0x10f   :  { %1110 = vmatprep.subr.mxu1 %v1457_v0 }
 0x110   :  { %1111 = vmatpush3.msra.mxu1 %v1523_v6 }
 0x111   :  { %1112 = vmatprep.subr.mxu1 %v1457_v0 }
 0x112   :  { %1113 = vmatpush3.msra.mxu1 %v1527_v8 }
 0x113   :  { %1114 = vmatprep.subr.mxu1 %v1457_v0 }
 0x114   :  { %1115 = vmatpush3.msra.mxu1 %v1531_v10 }
 0x115   :  { %1116 = vmatprep.subr.mxu1 %v1457_v0 }
 0x116   :  { %1117 = vmatpush3.msra.mxu1 %v1535_v11 }
 0x117   :  { %1118 = vmatprep.subr.mxu1 %v1457_v0  ;;  %v1031_v39 = vpop.f32.mrf.mxu0 }
 0x118   :  { %1119 = vmatpush3.msra.mxu1 %v1540_v12  ;;  %v205_v50 = vadd.f32 %v1031_v39, %v1624_v24 }
 0x119   :  { %1120 = vmatprep.subr.mxu1 %v1457_v0  ;;  %v199_v40 = vpop.f32.mrf.mxu0 }
 0x11a   :  { %1121 = vmatpush3.msra.mxu1 %v1559_v13  ;;  %v200_v45 = vadd.f32 %v1624_v24, %v199_v40 }
 0x11b   :  { %1122 = vmatprep.subr.mxu1 %v1457_v0  ;;  %v1704_v41 = vpop.f32.mrf.mxu0 }
 0x11c   :  { %1123 = vmatpush3.msra.mxu1 %v1564_v14  ;;  %v215_v60 = vadd.f32 %v1704_v41, %v1624_v24 }
 0x11d   :  { %1124 = vmatprep.subr.mxu1 %v1457_v0  ;;  %v1706_v42 = vpop.f32.mrf.mxu0 }
 0x11e   :  { %1125 = vmatpush3.msra.mxu1 %v1570_v15  ;;  %v210_v55 = vadd.f32 %v1624_v24, %v1706_v42 }
 0x11f   :  { %1126 = vmatprep.subr.mxu1 %v1457_v0  ;;  %v1708_v43 = vpop.f32.mrf.mxu0 }
 0x120   :  { %1127 = vmatpush3.msra.mxu1 %v1576_v16  ;;  %v225_v23 = vadd.f32 %v1708_v43, %v1624_v24 }
 0x121   :  { %1128 = vmatprep.subr.mxu1 %v1457_v0  ;;  %v1710_v44 = vpop.f32.mrf.mxu0 }
 0x122   :  { %1129 = vmatpush3.msra.mxu1 %v1578_v17  ;;  %v220_v9 = vadd.f32 %v1624_v24, %v1710_v44 }
 0x123   :  { %1130 = vmatprep.subr.mxu1 %v1457_v0 }
 0x124   :  { %1131 = vmatpush3.msra.mxu1 %v1585_v18 }
 0x125   :  { %1132 = vmatprep.subr.mxu1 %v1457_v0 }
 0x126   :  { %1133 = vmatpush3.msra.mxu1 %v1591_v19 }
 0x127   :  { %1134 = vmatprep.subr.mxu1 %v1457_v0 }
 0x128   :  { %1135 = vmatpush3.msra.mxu1 %v1597_v20 }
 0x129   :  { %1136 = vmatprep.subr.mxu1 %v1457_v0 }
 0x12a   :  { %1137 = vmatpush3.msra.mxu1 %v1603_v21 }
 0x12b   :  { %1138 = vmatprep.subr.mxu1 %v1457_v0 }
 0x12c   :  { %1139 = vmatpush3.msra.mxu1 %v1609_v22 }
 0x12d   :  { %1178 = vmatprep.subr.mxu1 %v1457_v0 }
 0x1cd   :  { %v311_v35 = vpop.f32.mrf.mxu1 }
 0x1ce   :  { %v315_v36 = vadd.f32 %v311_v35, %v195_v34 }
 0x1cf   :  { %v1072_v37 = vpop.f32.mrf.mxu1 }
 0x1d0   :  { %1329 = vtanh.f32 %v315_v36 }
 0x1dd   :  { %v1330_v38 = vpop.eup %1329 }
 0x1de   :  { %1106 = vmatmul.mubr.f32.vlgmr.msra.gmra.mxu0 %v1330_v38 }
 0x1df   :  { %1144 = vmatpush3.msra.mxu0 %v1521_v5  ;;  %1175 = vmatprep.mubr.msk.f32.mxu0 %vm1458_vm1, %v1457_v0 }
 0x1e0   :  { %1145 = vmatprep.subr.mxu0 %v1457_v0 }
 0x1e1   :  { %1146 = vmatpush3.msra.mxu0 %v1523_v6 }
 0x1e2   :  { %1147 = vmatprep.subr.mxu0 %v1457_v0 }
 0x1e3   :  { %1148 = vmatpush3.msra.mxu0 %v1527_v8 }
 0x1e4   :  { %1149 = vmatprep.subr.mxu0 %v1457_v0 }
 0x1e5   :  { %1150 = vmatpush3.msra.mxu0 %v1531_v10 }
 0x1e6   :  { %1151 = vmatprep.subr.mxu0 %v1457_v0 }
 0x1e7   :  { %1152 = vmatpush3.msra.mxu0 %v1535_v11 }
 0x1e8   :  { %1153 = vmatprep.subr.mxu0 %v1457_v0 }
 0x1e9   :  { %1154 = vmatpush3.msra.mxu0 %v1540_v12 }
 0x1ea   :  { %1155 = vmatprep.subr.mxu0 %v1457_v0 }
 0x1eb   :  { %1156 = vmatpush3.msra.mxu0 %v1559_v13 }
 0x1ec   :  { %1157 = vmatprep.subr.mxu0 %v1457_v0 }
 0x1ed   :  { %1158 = vmatpush3.msra.mxu0 %v1564_v14 }
 0x1ee   :  { %1159 = vmatprep.subr.mxu0 %v1457_v0 }
 0x1ef   :  { %1160 = vmatpush3.msra.mxu0 %v1570_v15 }
 0x1f0   :  { %1161 = vmatprep.subr.mxu0 %v1457_v0 }
 0x1f1   :  { %1162 = vmatpush3.msra.mxu0 %v1576_v16 }
 0x1f2   :  { %1163 = vmatprep.subr.mxu0 %v1457_v0 }
 0x1f3   :  { %1164 = vmatpush3.msra.mxu0 %v1578_v17 }
 0x1f4   :  { %1165 = vmatprep.subr.mxu0 %v1457_v0 }
 0x1f5   :  { %1166 = vmatpush3.msra.mxu0 %v1585_v18 }
 0x1f6   :  { %1167 = vmatprep.subr.mxu0 %v1457_v0 }
 0x1f7   :  { %1168 = vmatpush3.msra.mxu0 %v1591_v19 }
 0x1f8   :  { %1169 = vmatprep.subr.mxu0 %v1457_v0 }
 0x1f9   :  { %1170 = vmatpush3.msra.mxu0 %v1597_v20 }
 0x1fa   :  { %1171 = vmatprep.subr.mxu0 %v1457_v0 }
 0x1fb   :  { %1172 = vmatpush3.msra.mxu0 %v1603_v21 }
 0x1fc   :  { %1173 = vmatprep.subr.mxu0 %v1457_v0 }
 0x1fd   :  { %1174 = vmatpush3.msra.mxu0 %v1609_v22 }
 0x1fe   :  { %1213 = vmatprep.subr.mxu0 %v1457_v0 }
 0x29e   :  { %v383_v46 = vpop.f32.mrf.mxu0 }
 0x29f   :  { %v387_v47 = vadd.f32 %v383_v46, %v200_v45 }
 0x2a0   :  { %v1107_v48 = vpop.f32.mrf.mxu0 }
 0x2a1   :  { %1331 = vtanh.f32 %v387_v47 }
 0x2ae   :  { %v1332_v49 = vpop.eup %1331 }
 0x2af   :  { %1141 = vmatmul.mubr.f32.vlgmr.msra.gmra.mxu1 %v1332_v49 }
 0x2b0   :  { %1179 = vmatpush3.msra.mxu1 %v1521_v5  ;;  %1210 = vmatprep.mubr.msk.f32.mxu1 %vm1458_vm1, %v1457_v0 }
 0x2b1   :  { %1180 = vmatprep.subr.mxu1 %v1457_v0 }
 0x2b2   :  { %1181 = vmatpush3.msra.mxu1 %v1523_v6 }
 0x2b3   :  { %1182 = vmatprep.subr.mxu1 %v1457_v0 }
 0x2b4   :  { %1183 = vmatpush3.msra.mxu1 %v1527_v8 }
 0x2b5   :  { %1184 = vmatprep.subr.mxu1 %v1457_v0 }
 0x2b6   :  { %1185 = vmatpush3.msra.mxu1 %v1531_v10 }
 0x2b7   :  { %1186 = vmatprep.subr.mxu1 %v1457_v0 }
 0x2b8   :  { %1187 = vmatpush3.msra.mxu1 %v1535_v11 }
 0x2b9   :  { %1188 = vmatprep.subr.mxu1 %v1457_v0 }
 0x2ba   :  { %1189 = vmatpush3.msra.mxu1 %v1540_v12 }
 0x2bb   :  { %1190 = vmatprep.subr.mxu1 %v1457_v0 }
 0x2bc   :  { %1191 = vmatpush3.msra.mxu1 %v1559_v13 }
 0x2bd   :  { %1192 = vmatprep.subr.mxu1 %v1457_v0 }
 0x2be   :  { %1193 = vmatpush3.msra.mxu1 %v1564_v14 }
 0x2bf   :  { %1194 = vmatprep.subr.mxu1 %v1457_v0 }
 0x2c0   :  { %1195 = vmatpush3.msra.mxu1 %v1570_v15 }
 0x2c1   :  { %1196 = vmatprep.subr.mxu1 %v1457_v0 }
 0x2c2   :  { %1197 = vmatpush3.msra.mxu1 %v1576_v16 }
 0x2c3   :  { %1198 = vmatprep.subr.mxu1 %v1457_v0 }
 0x2c4   :  { %1199 = vmatpush3.msra.mxu1 %v1578_v17 }
 0x2c5   :  { %1200 = vmatprep.subr.mxu1 %v1457_v0 }
 0x2c6   :  { %1201 = vmatpush3.msra.mxu1 %v1585_v18 }
 0x2c7   :  { %1202 = vmatprep.subr.mxu1 %v1457_v0 }
 0x2c8   :  { %1203 = vmatpush3.msra.mxu1 %v1591_v19 }
 0x2c9   :  { %1204 = vmatprep.subr.mxu1 %v1457_v0 }
 0x2ca   :  { %1205 = vmatpush3.msra.mxu1 %v1597_v20 }
 0x2cb   :  { %1206 = vmatprep.subr.mxu1 %v1457_v0 }
 0x2cc   :  { %1207 = vmatpush3.msra.mxu1 %v1603_v21 }
 0x2cd   :  { %1208 = vmatprep.subr.mxu1 %v1457_v0 }
 0x2ce   :  { %1209 = vmatpush3.msra.mxu1 %v1609_v22 }
 0x2cf   :  { %1248 = vmatprep.subr.mxu1 %v1457_v0 }
 0x36f   :  { %v455_v51 = vpop.f32.mrf.mxu1 }
 0x370   :  { %v459_v52 = vadd.f32 %v455_v51, %v205_v50 }
 0x371   :  { %v1142_v53 = vpop.f32.mrf.mxu1 }
 0x372   :  { %1333 = vtanh.f32 %v459_v52 }
 0x37f   :  { %v1334_v54 = vpop.eup %1333 }
 0x380   :  { %1176 = vmatmul.mubr.f32.vlgmr.msra.gmra.mxu0 %v1334_v54 }
 0x381   :  { %1214 = vmatpush3.msra.mxu0 %v1521_v5  ;;  %1245 = vmatprep.mubr.msk.f32.mxu0 %vm1458_vm1, %v1457_v0 }
 0x382   :  { %1215 = vmatprep.subr.mxu0 %v1457_v0 }
 0x383   :  { %1216 = vmatpush3.msra.mxu0 %v1523_v6 }
 0x384   :  { %1217 = vmatprep.subr.mxu0 %v1457_v0 }
 0x385   :  { %1218 = vmatpush3.msra.mxu0 %v1527_v8 }
 0x386   :  { %1219 = vmatprep.subr.mxu0 %v1457_v0 }
 0x387   :  { %1220 = vmatpush3.msra.mxu0 %v1531_v10 }
 0x388   :  { %1221 = vmatprep.subr.mxu0 %v1457_v0 }
 0x389   :  { %1222 = vmatpush3.msra.mxu0 %v1535_v11 }
 0x38a   :  { %1223 = vmatprep.subr.mxu0 %v1457_v0 }
 0x38b   :  { %1224 = vmatpush3.msra.mxu0 %v1540_v12 }
 0x38c   :  { %1225 = vmatprep.subr.mxu0 %v1457_v0 }
 0x38d   :  { %1226 = vmatpush3.msra.mxu0 %v1559_v13 }
 0x38e   :  { %1227 = vmatprep.subr.mxu0 %v1457_v0 }
 0x38f   :  { %1228 = vmatpush3.msra.mxu0 %v1564_v14 }
 0x390   :  { %1229 = vmatprep.subr.mxu0 %v1457_v0 }
 0x391   :  { %1230 = vmatpush3.msra.mxu0 %v1570_v15 }
 0x392   :  { %1231 = vmatprep.subr.mxu0 %v1457_v0 }
 0x393   :  { %1232 = vmatpush3.msra.mxu0 %v1576_v16 }
 0x394   :  { %1233 = vmatprep.subr.mxu0 %v1457_v0 }
 0x395   :  { %1234 = vmatpush3.msra.mxu0 %v1578_v17 }
 0x396   :  { %1235 = vmatprep.subr.mxu0 %v1457_v0 }
 0x397   :  { %1236 = vmatpush3.msra.mxu0 %v1585_v18 }
 0x398   :  { %1237 = vmatprep.subr.mxu0 %v1457_v0 }
 0x399   :  { %1238 = vmatpush3.msra.mxu0 %v1591_v19 }
 0x39a   :  { %1239 = vmatprep.subr.mxu0 %v1457_v0 }
 0x39b   :  { %1240 = vmatpush3.msra.mxu0 %v1597_v20 }
 0x39c   :  { %1241 = vmatprep.subr.mxu0 %v1457_v0 }
 0x39d   :  { %1242 = vmatpush3.msra.mxu0 %v1603_v21 }
 0x39e   :  { %1243 = vmatprep.subr.mxu0 %v1457_v0 }
 0x39f   :  { %1244 = vmatpush3.msra.mxu0 %v1609_v22 }
 0x3a0   :  { %1283 = vmatprep.subr.mxu0 %v1457_v0 }
 0x440   :  { %v527_v56 = vpop.f32.mrf.mxu0 }
 0x441   :  { %v531_v57 = vadd.f32 %v527_v56, %v210_v55 }
 0x442   :  { %v1177_v58 = vpop.f32.mrf.mxu0 }
 0x443   :  { %1335 = vtanh.f32 %v531_v57 }
 0x450   :  { %v1336_v59 = vpop.eup %1335 }
 0x451   :  { %1211 = vmatmul.mubr.f32.vlgmr.msra.gmra.mxu1 %v1336_v59 }
 0x452   :  { %1249 = vmatpush3.msra.mxu1 %v1521_v5  ;;  %1280 = vmatprep.mubr.msk.f32.mxu1 %vm1458_vm1, %v1457_v0  ;;  %v761_v5 = vld [vmem:[#allocation8 + $0x60] sm:$0xff] }
 0x453   :  { %1250 = vmatprep.subr.mxu1 %v1457_v0 }
 0x454   :  { %1251 = vmatpush3.msra.mxu1 %v1523_v6  ;;  %v760_v6 = vld [vmem:[#allocation8 + $0x58] sm:$0xff] }
 0x455   :  { %1252 = vmatprep.subr.mxu1 %v1457_v0 }
 0x456   :  { %1253 = vmatpush3.msra.mxu1 %v1527_v8  ;;  %v758_v8 = vld [vmem:[#allocation8 + $0x48] sm:$0xff] }
 0x457   :  { %1254 = vmatprep.subr.mxu1 %v1457_v0 }
 0x458   :  { %1255 = vmatpush3.msra.mxu1 %v1531_v10 }
 0x459   :  { %1256 = vmatprep.subr.mxu1 %v1457_v0 }
 0x45a   :  { %1257 = vmatpush3.msra.mxu1 %v1535_v11 }
 0x45b   :  { %1258 = vmatprep.subr.mxu1 %v1457_v0 }
 0x45c   :  { %1259 = vmatpush3.msra.mxu1 %v1540_v12 }
 0x45d   :  { %1260 = vmatprep.subr.mxu1 %v1457_v0 }
 0x45e   :  { %1261 = vmatpush3.msra.mxu1 %v1559_v13 }
 0x45f   :  { %1262 = vmatprep.subr.mxu1 %v1457_v0 }
 0x460   :  { %1263 = vmatpush3.msra.mxu1 %v1564_v14  ;;  %v757_v14 = vld [vmem:[#allocation8 + $0x40] sm:$0xff] }
 0x461   :  { %1264 = vmatprep.subr.mxu1 %v1457_v0 }
 0x462   :  { %1265 = vmatpush3.msra.mxu1 %v1570_v15  ;;  %v756_v15 = vld [vmem:[#allocation8 + $0x38] sm:$0xff] }
 0x463   :  { %1266 = vmatprep.subr.mxu1 %v1457_v0 }
 0x464   :  { %1267 = vmatpush3.msra.mxu1 %v1576_v16  ;;  %v755_v16 = vld [vmem:[#allocation8 + $0x30] sm:$0xff] }
 0x465   :  { %1268 = vmatprep.subr.mxu1 %v1457_v0 }
 0x466   :  { %1269 = vmatpush3.msra.mxu1 %v1578_v17  ;;  %v754_v17 = vld [vmem:[#allocation8 + $0x28] sm:$0xff] }
 0x467   :  { %1270 = vmatprep.subr.mxu1 %v1457_v0 }
 0x468   :  { %1271 = vmatpush3.msra.mxu1 %v1585_v18  ;;  %v753_v18 = vld [vmem:[#allocation8 + $0x20] sm:$0xff] }
 0x469   :  { %1272 = vmatprep.subr.mxu1 %v1457_v0 }
 0x46a   :  { %1273 = vmatpush3.msra.mxu1 %v1591_v19  ;;  %v752_v19 = vld [vmem:[#allocation8 + $0x18] sm:$0xff] }
 0x46b   :  { %1274 = vmatprep.subr.mxu1 %v1457_v0 }
 0x46c   :  { %1275 = vmatpush3.msra.mxu1 %v1597_v20  ;;  %v751_v20 = vld [vmem:[#allocation8 + $0x10] sm:$0xff] }
 0x46d   :  { %1276 = vmatprep.subr.mxu1 %v1457_v0 }
 0x46e   :  { %1277 = vmatpush3.msra.mxu1 %v1603_v21  ;;  %v750_v21 = vld [vmem:[#allocation8 + $0x8] sm:$0xff] }
 0x46f   :  { %1278 = vmatprep.subr.mxu1 %v1457_v0 }
 0x470   :  { %1279 = vmatpush3.msra.mxu1 %v1609_v22  ;;  %v749_v22 = vld [vmem:[#allocation8] sm:$0xff] }
 0x511   :  { %v599_v61 = vpop.f32.mrf.mxu1 }
 0x512   :  { %v603_v62 = vadd.f32 %v599_v61, %v215_v60 }
 0x513   :  { %v1212_v63 = vpop.f32.mrf.mxu1 }
 0x514   :  { %1337 = vtanh.f32 %v603_v62 }
 0x521   :  { %v1338_v1 = vpop.eup %1337 }
 0x522   :  { %1246 = vmatmul.mubr.f32.vlgmr.msra.gmra.mxu0 %v1338_v1 }
 0x523   :  { %1315 = vmatprep.mubr.msk.f32.mxu0 %vm1458_vm1, %v1457_v0  ;;  %1284 = vmatpush3.msra.mxu0 %v764_v2 }
 0x524   :  { %1285 = vmatprep.subr.mxu0 %v1457_v0 }
 0x525   :  { %1286 = vmatpush3.msra.mxu0 %v763_v3 }
 0x526   :  { %1287 = vmatprep.subr.mxu0 %v1457_v0 }
 0x527   :  { %1288 = vmatpush3.msra.mxu0 %v762_v4 }
 0x528   :  { %1289 = vmatprep.subr.mxu0 %v1457_v0 }
 0x529   :  { %1290 = vmatpush3.msra.mxu0 %v761_v5 }
 0x52a   :  { %1291 = vmatprep.subr.mxu0 %v1457_v0 }
 0x52b   :  { %1292 = vmatpush3.msra.mxu0 %v760_v6 }
 0x52c   :  { %1293 = vmatprep.subr.mxu0 %v1457_v0 }
 0x52d   :  { %1294 = vmatpush3.msra.mxu0 %v759_v7 }
 0x52e   :  { %1295 = vmatprep.subr.mxu0 %v1457_v0 }
 0x52f   :  { %1296 = vmatpush3.msra.mxu0 %v758_v8 }
 0x530   :  { %1297 = vmatprep.subr.mxu0 %v1457_v0 }
 0x531   :  { %1298 = vmatpush3.msra.mxu0 %v757_v14 }
 0x532   :  { %1299 = vmatprep.subr.mxu0 %v1457_v0 }
 0x533   :  { %1300 = vmatpush3.msra.mxu0 %v756_v15 }
 0x534   :  { %1301 = vmatprep.subr.mxu0 %v1457_v0 }
 0x535   :  { %1302 = vmatpush3.msra.mxu0 %v755_v16 }
 0x536   :  { %1303 = vmatprep.subr.mxu0 %v1457_v0 }
 0x537   :  { %1304 = vmatpush3.msra.mxu0 %v754_v17 }
 0x538   :  { %1305 = vmatprep.subr.mxu0 %v1457_v0 }
 0x539   :  { %1306 = vmatpush3.msra.mxu0 %v753_v18 }
 0x53a   :  { %1307 = vmatprep.subr.mxu0 %v1457_v0 }
 0x53b   :  { %1308 = vmatpush3.msra.mxu0 %v752_v19 }
 0x53c   :  { %1309 = vmatprep.subr.mxu0 %v1457_v0 }
 0x53d   :  { %1310 = vmatpush3.msra.mxu0 %v751_v20 }
 0x53e   :  { %1311 = vmatprep.subr.mxu0 %v1457_v0 }
 0x53f   :  { %1312 = vmatpush3.msra.mxu0 %v750_v21 }
 0x540   :  { %1313 = vmatprep.subr.mxu0 %v1457_v0 }
 0x541   :  { %1314 = vmatpush3.msra.mxu0 %v749_v22 }
 0x5e2   :  { %v671_v10 = vpop.f32.mrf.mxu0 }
 0x5e3   :  { %v675_v11 = vadd.f32 %v671_v10, %v220_v9 }
 0x5e4   :  { %v1247_v12 = vpop.f32.mrf.mxu0 }
 0x5e5   :  { %1339 = vtanh.f32 %v675_v11 }
 0x5f2   :  { %v1340_v13 = vpop.eup %1339 }
 0x5f3   :  { %1281 = vmatmul.mubr.f32.vlgmr.msra.gmra.mxu1 %v1340_v13 }
 0x6b3   :  { %v743_v25 = vpop.f32.mrf.mxu1 }
 0x6b4   :  { %v747_v26 = vadd.f32 %v743_v25, %v225_v23 }
 0x6b5   :  { %v1282_v27 = vpop.f32.mrf.mxu1 }
 0x6b6   :  { %1341 = vtanh.f32 %v747_v26 }
 0x6c3   :  { %v1342_v28 = vpop.eup %1341 }
 0x6c4   :  { %1316 = vmatmul.mubr.f32.vlgmr.msra.gmra.mxu0 %v1342_v28 }
 0x784   :  { %v838_v30 = vpop.f32.mrf.mxu0 }
 0x785   :  { %v839_v31 = vadd.f32 %v869_v29, %v838_v30 }
 0x786   :  { %v1317_v0 = vpop.f32.mrf.mxu0 }
 0x787   :  { %842 = vst [vmem:[#allocation10] sm:$0xff] %v839_v31 }
 0x788   :  { %1434 = shalt.err (!%p1431_p10)
}
 0x789   :  { %852 = dma.vmem_to_hbm [thread:$0]  %s850_s19, 128, %s1852_s6, [#allocation4]  }
 0x78a   :  { %1449 = dma.done.wait [#allocation4], 128  }
 0x78b   :  { %1450 = vsyncadd [#allocation4], 4294967168 }
 0x78c   :  { %856 = vsyncpa [#allocation3], 1 }
 0x78d   :  { %857 = vsyncpa [#allocation6], 1 }
 0x78e   :  { %858 = vsyncpa [#allocation9], 1 }
 0x78f   :  { %859 = vsyncpa [#allocation4], 1 }

</bundles_post_ra>
